<compile_context>
chip_gen: v5e
topology: v5e:2x2
jax: 0.10.0
libtpu: 0.0.40
codegen_flags: <defaults>
</compile_context>

<pallas_src>
import functools
import math

import jax
import jax.numpy as jnp
from jax.experimental import pallas as pl
from jax.experimental.pallas import tpu as pltpu


# ----------------------------------------------------------------------------
# helpers
# ----------------------------------------------------------------------------
def _round_up(x, m):
    return ((x + m - 1) // m) * m


def _pad_to(x, m, axis):
    pad = (-x.shape[axis]) % m
    if pad == 0:
        return x
    cfg = [(0, 0)] * x.ndim
    cfg[axis] = (0, pad)
    return jnp.pad(x, cfg)


def _pick_tm(M, cap=256):
    """Row tile: multiple of 16 (bf16 sublane packing), shape-aware to limit padding."""
    nt = max(1, -(-M // cap))
    return _round_up(-(-M // nt), 16)


def _pick_tn(N):
    """Output-column tile. N<=256 -> keep full dim (no padded write-back lanes)."""
    if N <= 256:
        return N, N
    return 256, _round_up(N, 256)


def _pick_tk(K):
    if K <= 512:
        return K, K
    Kp = _round_up(K, 128)
    for tk in (512, 384, 256, 128):
        if Kp % tk == 0:
            return tk, Kp
    return 128, Kp


def _row_tile_exact(M, C, target_bytes=2 << 20):
    """Largest divisor of M that is a multiple of 8 within a VMEM byte budget.
    Exact tiling (no padded rows) so batch-stat reductions stay correct."""
    cap = min(M, max(8, target_bytes // (4 * C)))
    if M >= 16:
        cap = min(cap, M // 2)          # prefer >=2 grid steps (pipelining / megacore)
    cap = (cap // 8) * 8
    for d in range(cap, 7, -8):
        if M % d == 0:
            return d
    return M


def _lane_tile_exact(M, cap=4096):
    cap = min(cap, M)
    cap = (cap // 128) * 128
    for d in range(cap, 127, -128):
        if M % d == 0:
            return d
    return M


# ----------------------------------------------------------------------------
# Pallas kernel 1: tiled matmul + bias (bf16 operands, f32 accumulation)
# ----------------------------------------------------------------------------
def _matmul_kernel(a_ref, b_ref, bias_ref, o_ref, acc_ref):
    @pl.when(pl.program_id(2) == 0)
    def _():
        acc_ref[...] = jnp.zeros_like(acc_ref)

    acc_ref[...] += jnp.dot(a_ref[...], b_ref[...],
                            preferred_element_type=jnp.float32)

    @pl.when(pl.program_id(2) == pl.num_programs(2) - 1)
    def _():
        o_ref[...] = (acc_ref[...] + bias_ref[...]).astype(o_ref.dtype)


def matmul_bias(a, b, bias=None):
    """(M,K) @ (K,N) + bias on the MXU, bf16 inputs, f32 accumulator/output."""
    M, K = a.shape
    _, N = b.shape
    tm = _pick_tm(M)
    tn, _ = _pick_tn(N)
    tk, _ = _pick_tk(K)
    a_p = _pad_to(_pad_to(a, tm, 0), tk, 1).astype(jnp.bfloat16)
    b_p = _pad_to(_pad_to(b, tk, 0), tn, 1).astype(jnp.bfloat16)
    if bias is None:
        bias_p = jnp.zeros((1, b_p.shape[1]), jnp.float32)
    else:
        bias_p = _pad_to(bias.reshape(1, N).astype(jnp.float32), tn, 1)
    Mp, Kp = a_p.shape
    Np = b_p.shape[1]

    out = pl.pallas_call(
        _matmul_kernel,
        out_shape=jax.ShapeDtypeStruct((Mp, Np), jnp.float32),
        grid=(Mp // tm, Np // tn, Kp // tk),
        in_specs=[
            pl.BlockSpec((tm, tk), lambda i, j, k: (i, k)),
            pl.BlockSpec((tk, tn), lambda i, j, k: (k, j)),
            pl.BlockSpec((1, tn), lambda i, j, k: (0, j)),
        ],
        out_specs=pl.BlockSpec((tm, tn), lambda i, j, k: (i, j)),
        scratch_shapes=[pltpu.VMEM((tm, tn), jnp.float32)],
        compiler_params=pltpu.CompilerParams(
            dimension_semantics=("parallel", "parallel", "arbitrary")),
    )(a_p, b_p, bias_p)
    return out[:M, :N]


# ----------------------------------------------------------------------------
# Pallas kernel 2: implicit-GEMM stride-1 KxK conv (no im2col materialization)
#   padded input is flattened (N, Hp*Wp, Cin) and left in HBM; each reduction
#   step (ki,kj,cin-tile) DMAs a row window shifted by ki*Wp+kj into a
#   double-buffered VMEM tile, and accumulates a bf16 matmul into f32 scratch.
# ----------------------------------------------------------------------------
def _make_igconv_kernel(KW, Wp, nci, R, TM, TC):
    def kernel(x_hbm, w_ref, b_ref, o_ref, acc_ref, lhs_buf, sem):
        n = pl.program_id(0)
        i = pl.program_id(1)
        r = pl.program_id(3)
        m0 = i * TM

        def issue(rr, slot):
            t = rr // nci
            c = rr - t * nci
            ki = t // KW
            kj = t - ki * KW
            off = ki * Wp + kj
            pltpu.make_async_copy(
                x_hbm.at[n, pl.ds(m0 + off, TM), pl.ds(c * TC, TC)],
                lhs_buf.at[slot], sem.at[slot]).start()

        @pl.when(r == 0)
        def _():
            acc_ref[...] = jnp.zeros_like(acc_ref)
            issue(0, 0)

        slot = r % 2

        # wait for this step's LHS tile
        pltpu.make_async_copy(
            x_hbm.at[0, pl.ds(0, TM), pl.ds(0, TC)],
            lhs_buf.at[slot], sem.at[slot]).wait()

        # prefetch next reduction step's LHS (overlaps the matmul below)
        @pl.when(r + 1 < R)
        def _():
            issue(r + 1, 1 - slot)

        acc_ref[...] += jnp.dot(lhs_buf[slot], w_ref[...],
                                preferred_element_type=jnp.float32)

        @pl.when(r == R - 1)
        def _():
            o_ref[...] = (acc_ref[...] + b_ref[...]).astype(o_ref.dtype)

    return kernel


@functools.partial(jax.jit, static_argnames=("pad",))
def _conv_igemm_jit(x, w, bias, pad):
    N, H, W, Cin = x.shape
    KH, KW, _, Cout = w.shape
    Hp, Wp = H + 2 * pad, W + 2 * pad
    Ho, Wo = Hp - KH + 1, Wp - KW + 1
    Mfull = Hp * Wp                          # compute at all padded positions,
    TM = _pick_tm(Mfull)                     # then discard the wrap columns/rows
    Mp = _round_up(Mfull, TM)
    TC = Cin if Cin <= 512 else 512
    nci = Cin // TC
    TN, Np = _pick_tn(Cout)
    R = KH * KW * nci
    max_off = (KH - 1) * Wp + (KW - 1)

    xp = jnp.pad(x, ((0, 0), (pad, pad), (pad, pad), (0, 0)))
    xflat = xp.reshape(N, Mfull, Cin)
    xflat = jnp.pad(xflat, ((0, 0), (0, Mp - Mfull + max_off), (0, 0)))
    xflat = xflat.astype(jnp.bfloat16)

    wk = _pad_to(w.reshape(KH * KW, Cin, Cout), TN, 2).astype(jnp.bfloat16)
    if bias is None:
        bias_p = jnp.zeros((1, Np), jnp.float32)
    else:
        bias_p = _pad_to(bias.reshape(1, Cout).astype(jnp.float32), TN, 1)

    out = pl.pallas_call(
        _make_igconv_kernel(KW, Wp, nci, R, TM, TC),
        out_shape=jax.ShapeDtypeStruct((N, Mp, Np), jnp.float32),
        grid=(N, Mp // TM, Np // TN, R),
        in_specs=[
            pl.BlockSpec(memory_space=pl.ANY),                                   # xflat (HBM)
            pl.BlockSpec((None, TC, TN), lambda n, i, j, r: (r // nci, r % nci, j)),
            pl.BlockSpec((1, TN), lambda n, i, j, r: (0, j)),
        ],
        out_specs=pl.BlockSpec((None, TM, TN), lambda n, i, j, r: (n, i, j)),
        scratch_shapes=[pltpu.VMEM((TM, TN), jnp.float32),
                        pltpu.VMEM((2, TM, TC), jnp.bfloat16),
                        pltpu.SemaphoreType.DMA((2,))],
        compiler_params=pltpu.CompilerParams(
            dimension_semantics=("parallel", "parallel", "parallel", "arbitrary")),
    )(xflat, wk, bias_p)

    y = out[:, :Mfull, :Cout].reshape(N, Hp, Wp, Cout)[:, :Ho, :Wo, :]
    return y


# ----------------------------------------------------------------------------
# Convolution dispatch: 1x1 direct, stride-1 KxK implicit GEMM, else im2col
# ----------------------------------------------------------------------------
@functools.partial(jax.jit, static_argnames=("stride",))
def _conv1x1_jit(x, w, b, stride):
    if stride > 1:
        x = x[:, ::stride, ::stride, :]
    N, H, W, cin = x.shape
    cout = w.shape[-1]
    y = matmul_bias(x.reshape(N * H * W, cin), w.reshape(cin, cout), b)
    return y.reshape(N, H, W, cout)


@functools.partial(jax.jit, static_argnames=("stride", "pad"))
def _conv_im2col_jit(x, w, b, stride, pad):
    # TODO(synk): only used for the stem 7x7/s2, mask 3x3/s2 and the 3 stride-2
    # bottleneck conv2s; an implicit-GEMM strided variant would remove this too.
    kh, kw, cin, cout = w.shape
    N, H, W, _ = x.shape
    Ho = (H + 2 * pad - kh) // stride + 1
    Wo = (W + 2 * pad - kw) // stride + 1
    xp = jnp.pad(x, ((0, 0), (pad, pad), (pad, pad), (0, 0)))
    cols = []
    for i in range(kh):
        for j in range(kw):
            cols.append(xp[:, i:i + stride * (Ho - 1) + 1:stride,
                              j:j + stride * (Wo - 1) + 1:stride, :])
    patches = jnp.concatenate(cols, axis=-1).reshape(N * Ho * Wo, kh * kw * cin)
    out = matmul_bias(patches, w.reshape(kh * kw * cin, cout), b)
    return out.reshape(N, Ho, Wo, cout)


def conv2d(x, w, b=None, stride=1, pad=0):
    kh, kw, cin, _ = w.shape
    if kh == 1 and kw == 1 and pad == 0:
        return _conv1x1_jit(x, w, b, stride=stride)
    if stride == 1 and (cin <= 512 or cin % 512 == 0):
        return _conv_igemm_jit(x, w, b, pad=pad)
    return _conv_im2col_jit(x, w, b, stride=stride, pad=pad)


# ----------------------------------------------------------------------------
# Pallas kernels 3/4: tiled BatchNorm (train-mode batch stats)
#   pass 1: one-pass sum / sum-of-squares reduction over M tiles
#   pass 2: normalize (+ optional residual) (+ ReLU), parallel over M tiles
# ----------------------------------------------------------------------------
def _bn_stats_kernel(x_ref, s_ref):
    @pl.when(pl.program_id(0) == 0)
    def _():
        s_ref[...] = jnp.zeros_like(s_ref)
    x = x_ref[...]
    s = jnp.sum(x, axis=0, keepdims=True)
    sq = jnp.sum(x * x, axis=0, keepdims=True)
    s_ref[...] += jnp.concatenate([s, sq], axis=0)


def _make_bn_apply_kernel(relu, add_res, inv_m):
    def kernel(x_ref, s_ref, g_ref, b_ref, *rest):
        if add_res:
            r_ref, o_ref = rest
        else:
            (o_ref,) = rest
        x = x_ref[...]
        mean = s_ref[0:1, :] * inv_m
        var = jnp.maximum(s_ref[1:2, :] * inv_m - mean * mean, 0.0)
        y = (x - mean) * jax.lax.rsqrt(var + 1e-5) * g_ref[...] + b_ref[...]
        if add_res:
            y = y + r_ref[...]
        if relu:
            y = jnp.maximum(y, 0.0)
        o_ref[...] = y
    return kernel


def _bn_impl(x2, g, b, res2, relu):
    M, C = x2.shape
    tm = _row_tile_exact(M, C)
    nmt = M // tm

    stats = pl.pallas_call(
        _bn_stats_kernel,
        out_shape=jax.ShapeDtypeStruct((2, C), jnp.float32),
        grid=(nmt,),
        in_specs=[pl.BlockSpec((tm, C), lambda i: (i, 0))],
        out_specs=pl.BlockSpec((2, C), lambda i: (0, 0)),
        compiler_params=pltpu.CompilerParams(
            dimension_semantics=("arbitrary",)),
    )(x2)

    in_specs = [pl.BlockSpec((tm, C), lambda i: (i, 0)),
                pl.BlockSpec((2, C), lambda i: (0, 0)),
                pl.BlockSpec((1, C), lambda i: (0, 0)),
                pl.BlockSpec((1, C), lambda i: (0, 0))]
    args = [x2, stats, g, b]
    if res2 is not None:
        in_specs.append(pl.BlockSpec((tm, C), lambda i: (i, 0)))
        args.append(res2)

    return pl.pallas_call(
        _make_bn_apply_kernel(relu, res2 is not None, 1.0 / M),
        out_shape=jax.ShapeDtypeStruct((M, C), jnp.float32),
        grid=(nmt,),
        in_specs=in_specs,
        out_specs=pl.BlockSpec((tm, C), lambda i: (i, 0)),
        compiler_params=pltpu.CompilerParams(
            dimension_semantics=("parallel",)),
    )(*args)


@functools.partial(jax.jit, static_argnames=("relu",))
def _bn_jit(x2, g, b, relu):
    return _bn_impl(x2, g, b, None, relu)


@jax.jit
def _bn_res_jit(x2, g, b, res2):
    return _bn_impl(x2, g, b, res2, True)


def bn(x, p, relu=True):
    N, H, W, C = x.shape
    y = _bn_jit(x.reshape(N * H * W, C), p["g"], p["b"], relu=relu)
    return y.reshape(N, H, W, C)


def bn_add_relu(x, p, res):
    N, H, W, C = x.shape
    y = _bn_res_jit(x.reshape(N * H * W, C), p["g"], p["b"],
                    res.reshape(N * H * W, C))
    return y.reshape(N, H, W, C)


# ----------------------------------------------------------------------------
# Pallas kernel 5: max-pool 3x3 / stride 2 / pad 1 (9 shifted views, tiled grid)
# ----------------------------------------------------------------------------
def _max9_kernel(*refs):
    o_ref = refs[9]
    m = refs[0][...]
    for t in range(1, 9):
        m = jnp.maximum(m, refs[t][...])
    o_ref[...] = m


@jax.jit
def maxpool3x3s2(x):
    # TODO(synk): the 9 strided views are still materialized by XLA; an in-kernel
    # windowed read of the padded input would remove that residual copy.
    N, H, W, C = x.shape
    k, stride, pad = 3, 2, 1
    Ho = (H + 2 * pad - k) // stride + 1
    Wo = (W + 2 * pad - k) // stride + 1
    xp = jnp.pad(x, ((0, 0), (pad, pad), (pad, pad), (0, 0)),
                 constant_values=-jnp.inf)
    M = N * Ho * Wo
    views = []
    for i in range(k):
        for j in range(k):
            views.append(xp[:, i:i + stride * (Ho - 1) + 1:stride,
                               j:j + stride * (Wo - 1) + 1:stride, :].reshape(M, C))
    tm = _row_tile_exact(M, C)
    out = pl.pallas_call(
        _max9_kernel,
        out_shape=jax.ShapeDtypeStruct((M, C), jnp.float32),
        grid=(M // tm,),
        in_specs=[pl.BlockSpec((tm, C), lambda i: (i, 0)) for _ in range(9)],
        out_specs=pl.BlockSpec((tm, C), lambda i: (i, 0)),
        compiler_params=pltpu.CompilerParams(
            dimension_semantics=("parallel",)),
    )(*views)
    return out.reshape(N, Ho, Wo, C)


# ----------------------------------------------------------------------------
# Pallas kernel 6: softmax + argmax, lane-dense (C, M) layout
# ----------------------------------------------------------------------------
def _softmax_argmax_kernel(x_ref, p_ref, l_ref):
    x = x_ref[...]                                    # (C, TL): pixels on lanes
    m = jnp.max(x, axis=0, keepdims=True)
    e = jnp.exp(x - m)
    p_ref[...] = e / jnp.sum(e, axis=0, keepdims=True)
    C = x.shape[0]
    iota = jax.lax.broadcasted_iota(jnp.int32, x.shape, 0)
    l_ref[...] = jnp.min(jnp.where(x == m, iota, C), axis=0, keepdims=True)


@jax.jit
def softmax_argmax(xt):
    C, M = xt.shape
    tl = _lane_tile_exact(M)
    return pl.pallas_call(
        _softmax_argmax_kernel,
        out_shape=(jax.ShapeDtypeStruct((C, M), jnp.float32),
                   jax.ShapeDtypeStruct((1, M), jnp.int32)),
        grid=(M // tl,),
        in_specs=[pl.BlockSpec((C, tl), lambda i: (0, i))],
        out_specs=(pl.BlockSpec((C, tl), lambda i: (0, i)),
                   pl.BlockSpec((1, tl), lambda i: (0, i))),
        compiler_params=pltpu.CompilerParams(
            dimension_semantics=("parallel",)),
    )(xt)


# ----------------------------------------------------------------------------
# Bilinear interpolation (glue, matches PyTorch interpolate align_corners=False)
# ----------------------------------------------------------------------------
@functools.partial(jax.jit, static_argnames=("size",))
def interp(x, size):
    # TODO(synk): done in JAX glue (jax.image.resize, half-pixel, no antialias),
    # not inside a Pallas kernel.
    N, H, W, C = x.shape
    return jax.image.resize(x, (N, size[0], size[1], C),
                            method="bilinear", antialias=False)


# ----------------------------------------------------------------------------
# Parameter construction (deterministic, synthetic)
# ----------------------------------------------------------------------------
class KeyGen:
    def __init__(self, seed):
        self.key = jax.random.PRNGKey(seed)
        self.i = 0

    def __call__(self):
        self.i += 1
        return jax.random.fold_in(self.key, self.i)


def conv_w(key, kh, kw, cin, cout):
    fan_in = kh * kw * cin
    return (jax.random.normal(key, (kh, kw, cin, cout), jnp.float32)
            * math.sqrt(2.0 / fan_in))


def bn_param(c):
    return {"g": jnp.ones((1, c), jnp.float32), "b": jnp.zeros((1, c), jnp.float32)}


def init_params(seed=42, num_classes=2):
    kg = KeyGen(seed)
    P = {}
    P["inmask_w"] = conv_w(kg(), 3, 3, 1, 64)
    P["inmask_b"] = jax.random.normal(kg(), (64,), jnp.float32) * 0.01

    enc = {"conv1": conv_w(kg(), 7, 7, 3, 64), "bn1": bn_param(64)}
    layers = []
    inplanes = 64
    for planes, blocks, stride in [(64, 3, 1), (128, 4, 2), (256, 6, 2), (512, 3, 2)]:
        layer = []
        for bi in range(blocks):
            s = stride if bi == 0 else 1
            blk = {
                "conv1": conv_w(kg(), 1, 1, inplanes, planes),
                "bn1": bn_param(planes),
                "conv2": conv_w(kg(), 3, 3, planes, planes),
                "bn2": bn_param(planes),
                "conv3": conv_w(kg(), 1, 1, planes, planes * 4),
                "bn3": bn_param(planes * 4),
                "stride": s,
                "down": ({"conv": conv_w(kg(), 1, 1, inplanes, planes * 4),
                          "bn": bn_param(planes * 4)} if bi == 0 else None),
            }
            layer.append(blk)
            inplanes = planes * 4
        layers.append(layer)
    enc["layers"] = layers
    P["enc"] = enc

    P["psp"] = [{"w": conv_w(kg(), 3, 3, 2048, 1024),
                 "b": jax.random.normal(kg(), (1024,), jnp.float32) * 0.01}
                for _ in range(4)]
    P["pspsq"] = {"conv1": conv_w(kg(), 1, 1, 4096, 512), "bn1": bn_param(512),
                  "conv2": conv_w(kg(), 3, 3, 512, 512), "bn2": bn_param(512)}
    P["skip"] = [{"w": conv_w(kg(), 1, 1, cin, cout), "bn": bn_param(cout)}
                 for cin, cout in [(1024, 512), (512, 256), (256, 128)]]
    P["up"] = [{"w": conv_w(kg(), 1, 1, cin, cout), "bn": bn_param(cout)}
               for cin, cout in [(1024, 512), (768, 256), (384, 128)]]
    P["final"] = conv_w(kg(), 3, 3, 128, num_classes)
    return P


# ----------------------------------------------------------------------------
# Forward pass
# ----------------------------------------------------------------------------
def bottleneck(blk, x):
    identity = x
    out = conv2d(x, blk["conv1"])
    out = bn(out, blk["bn1"], relu=True)
    out = conv2d(out, blk["conv2"], stride=blk["stride"], pad=1)
    out = bn(out, blk["bn2"], relu=True)
    out = conv2d(out, blk["conv3"])
    if blk["down"] is not None:
        identity = conv2d(x, blk["down"]["conv"], stride=blk["stride"])
        identity = bn(identity, blk["down"]["bn"], relu=False)
    return bn_add_relu(out, blk["bn3"], identity)


def net_forward(P, Images, InMask):
    # Images: (N, H, W, 3) float32 (NHWC), InMask: (N, H, W) float32
    mean = jnp.array([123.68, 116.779, 103.939], jnp.float32)
    std = jnp.array([65.0, 65.0, 65.0], jnp.float32)
    x = (Images.astype(jnp.float32) - mean) / std
    mask = InMask.astype(jnp.float32)[..., None]

    # Encoder stem + InMask encoder fusion:  relu(bn1(conv1(x)) + InMaskEncoder(mask))
    x = conv2d(x, P["enc"]["conv1"], stride=2, pad=3)
    r = conv2d(mask, P["inmask_w"], b=P["inmask_b"], stride=2, pad=1)
    x = bn_add_relu(x, P["enc"]["bn1"], r)
    x = maxpool3x3s2(x)

    skips = []
    for li, layer in enumerate(P["enc"]["layers"]):
        for blk in layer:
            x = bottleneck(blk, x)
        if li < 3:
            skips.append(x)

    # PSP
    PSPSize = (x.shape[1], x.shape[2])
    feats = []
    for i, sc in enumerate([1.0, 1 / 2, 1 / 4, 1 / 8]):
        ns = (max(int(PSPSize[0] * sc), 1), max(int(PSPSize[1] * sc), 1))
        y = interp(x, ns)
        y = conv2d(y, P["psp"][i]["w"], b=P["psp"][i]["b"], stride=1, pad=1)
        y = interp(y, PSPSize)
        feats.append(y)
    x = jnp.concatenate(feats, axis=-1)

    x = conv2d(x, P["pspsq"]["conv1"])
    x = bn(x, P["pspsq"]["bn1"], relu=True)
    x = conv2d(x, P["pspsq"]["conv2"], pad=0)     # 3x3 valid conv (as in the module)
    x = bn(x, P["pspsq"]["bn2"], relu=True)

    # Skip connections + upsample head
    for i in range(3):
        sf = skips[-1 - i]
        x = interp(x, (sf.shape[1], sf.shape[2]))
        s = conv2d(sf, P["skip"][i]["w"])
        s = bn(s, P["skip"][i]["bn"], relu=True)
        x = jnp.concatenate([s, x], axis=-1)
        x = conv2d(x, P["up"][i]["w"])
        x = bn(x, P["up"][i]["bn"], relu=True)

    x = conv2d(x, P["final"], pad=1)
    x = interp(x, (Images.shape[1], Images.shape[2]))

    N, H, W, C = x.shape
    xt = x.reshape(N * H * W, C).T                       # (C, M): lane-dense
    prob_t, lab = softmax_argmax(xt)
    Prob = jnp.transpose(prob_t.reshape(C, N, H, W), (1, 0, 2, 3))  # -> NCHW
    Labels = lab.reshape(N, H, W)                                    # int32 classes
    return Prob, Labels


# ----------------------------------------------------------------------------
if __name__ == "__main__":
    key = jax.random.PRNGKey(0)
    k1, k2 = jax.random.split(key)
    # Smallest spatial size that keeps every conv valid (layer4 map must be >= 3x3
    # because PSPSqueeze uses a 3x3 valid conv): 96 -> layer4 3x3.
    Images = jax.random.uniform(k1, (1, 96, 96, 3), jnp.float32, 0.0, 255.0)
    InMask = (jax.random.uniform(k2, (1, 96, 96), jnp.float32) > 0.5).astype(jnp.float32)

    params = init_params(seed=42, num_classes=2)
    Prob, Labels = net_forward(params, Images, InMask)
    jax.block_until_ready((Prob, Labels))

    assert Prob.shape == (1, 2, 96, 96)
    assert Labels.shape == (1, 96, 96)
    assert bool(jnp.all(jnp.isfinite(Prob)))
    print("KERNEL_OK")
</pallas_src>

<mosaic_0001>
module attributes {stable_mosaic.version = 11 : i64} {
  func.func @_matmul_kernel(%arg0: i32, %arg1: i32, %arg2: i32, %arg3: memref<256x147xbf16, #tpu.memory_space<vmem>>, %arg4: memref<147x64xbf16, #tpu.memory_space<vmem>>, %arg5: memref<1x64xf32, #tpu.memory_space<vmem>>, %arg6: memref<256x64xf32, #tpu.memory_space<vmem>>, %arg7: memref<256x64xf32, #tpu.memory_space<vmem>>) attributes {dimension_semantics = [#tpu.dimension_semantics<parallel>, #tpu.dimension_semantics<parallel>, #tpu.dimension_semantics<arbitrary>], iteration_bounds = array<i64: 9, 1, 1>, scalar_prefetch = 0 : i64, scratch_operands = 1 : i64, tpu.core_type = #tpu.core_type<tc>, window_params = [{transform_indices = @transform_0, window_bounds = array<i64: 256, 147>}, {transform_indices = @transform_1, window_bounds = array<i64: 147, 64>}, {transform_indices = @transform_2, window_bounds = array<i64: 1, 64>}, {transform_indices = @transform_3, window_bounds = array<i64: 256, 64>}]} {
    %c0_i32 = arith.constant 0 : i32
    %0 = arith.cmpi eq, %arg2, %c0_i32 : i32
    %1 = arith.extui %0 : i1 to i32
    %c0_i32_0 = arith.constant 0 : i32
    %2 = arith.cmpi ne, %1, %c0_i32_0 : i32
    scf.if %2 {
      %cst_10 = arith.constant 0.000000e+00 : f32
      %12 = vector.broadcast %cst_10 : f32 to vector<256x64xf32>
      %c0_11 = arith.constant 0 : index
      %c0_12 = arith.constant 0 : index
      %13 = vector.load %arg7[%c0_11, %c0_12] : memref<256x64xf32, #tpu.memory_space<vmem>>, vector<256x64xf32>
      tpu.vector_store %arg7[%c0_11, %c0_12], %12 {strides = array<i32>} : memref<256x64xf32, #tpu.memory_space<vmem>>, vector<256x64xf32>,
    } else {
    }
    %c0 = arith.constant 0 : index
    %c0_1 = arith.constant 0 : index
    %3 = vector.load %arg7[%c0, %c0_1] : memref<256x64xf32, #tpu.memory_space<vmem>>, vector<256x64xf32>
    %c0_2 = arith.constant 0 : index
    %c0_3 = arith.constant 0 : index
    %4 = vector.load %arg3[%c0_2, %c0_3] : memref<256x147xbf16, #tpu.memory_space<vmem>>, vector<256x147xbf16>
    %c0_4 = arith.constant 0 : index
    %c0_5 = arith.constant 0 : index
    %5 = vector.load %arg4[%c0_4, %c0_5] : memref<147x64xbf16, #tpu.memory_space<vmem>>, vector<147x64xbf16>
    %cst = arith.constant dense<0.000000e+00> : vector<256x64xf32>
    %6 = tpu.matmul %4, %5, %cst {dimension_numbers = #tpu.dot_dimension_numbers<[1], [0], [0], [1], [0, 0, 1, 1], [], []>} : vector<256x147xbf16>, vector<147x64xbf16>, vector<256x64xf32> -> vector<256x64xf32>
    %7 = arith.addf %3, %6 : vector<256x64xf32>
    %c0_6 = arith.constant 0 : index
    %c0_7 = arith.constant 0 : index
    %8 = vector.load %arg7[%c0_6, %c0_7] : memref<256x64xf32, #tpu.memory_space<vmem>>, vector<256x64xf32>
    tpu.vector_store %arg7[%c0_6, %c0_7], %7 {strides = array<i32>} : memref<256x64xf32, #tpu.memory_space<vmem>>, vector<256x64xf32>,
    %c0_i32_8 = arith.constant 0 : i32
    %9 = arith.cmpi eq, %arg2, %c0_i32_8 : i32
    %10 = arith.extui %9 : i1 to i32
    %c0_i32_9 = arith.constant 0 : i32
    %11 = arith.cmpi ne, %10, %c0_i32_9 : i32
    scf.if %11 {
      %c0_10 = arith.constant 0 : index
      %c0_11 = arith.constant 0 : index
      %12 = vector.load %arg7[%c0_10, %c0_11] : memref<256x64xf32, #tpu.memory_space<vmem>>, vector<256x64xf32>
      %c0_12 = arith.constant 0 : index
      %c0_13 = arith.constant 0 : index
      %13 = vector.load %arg5[%c0_12, %c0_13] : memref<1x64xf32, #tpu.memory_space<vmem>>, vector<1x64xf32>
      %14 = vector.broadcast %13 : vector<1x64xf32> to vector<256x64xf32>
      %15 = arith.addf %12, %14 : vector<256x64xf32>
      %c0_14 = arith.constant 0 : index
      %c0_15 = arith.constant 0 : index
      %16 = vector.load %arg6[%c0_14, %c0_15] : memref<256x64xf32, #tpu.memory_space<vmem>>, vector<256x64xf32>
      tpu.vector_store %arg6[%c0_14, %c0_15], %15 {strides = array<i32>} : memref<256x64xf32, #tpu.memory_space<vmem>>, vector<256x64xf32>,
    } else {
    }
    return
  }
  func.func @transform_0(%arg0: i32, %arg1: i32, %arg2: i32) -> (i32, i32) {
    %c0_i32 = arith.constant 0 : i32
    return %arg0, %arg2 : i32, i32
  }
  func.func @transform_1(%arg0: i32, %arg1: i32, %arg2: i32) -> (i32, i32) {
    %c0_i32 = arith.constant 0 : i32
    return %arg2, %arg1 : i32, i32
  }
  func.func @transform_2(%arg0: i32, %arg1: i32, %arg2: i32) -> (i32, i32) {
    %c0_i32 = arith.constant 0 : i32
    %c0_i32_0 = arith.constant 0 : i32
    return %c0_i32, %arg1 : i32, i32
  }
  func.func @transform_3(%arg0: i32, %arg1: i32, %arg2: i32) -> (i32, i32) {
    %c0_i32 = arith.constant 0 : i32
    return %arg0, %arg1 : i32, i32
  }
}

</mosaic_0001>

<bundles_post_ra>
// kernel: _conv_im2col_jit.1
= control target key start
LH: loop header
LB: loop body
LE: loop exit
PB: predicated region body
PF: predicated region fallthrough
CT: control target
= control target key end

     0   :  { %8 = vsyncpa [#allocation4], 0  ;;  %s1910_s0 = inlined_call_operand.vmem [shape: bf16[2304,147], index: 0, kind: input, shape index: {}]   ;;  %s1911_s1 = inlined_call_operand.vmem [shape: bf16[147,64], index: 1, kind: input, shape index: {}]   ;;  %s1912_s2 = inlined_call_operand.vmem [shape: f32[1,64], index: 2, kind: input, shape index: {}]   ;;  %s1913_s3 = inlined_call_operand.hbm [shape: f32[2304,64], index: 3, kind: output, shape index: {}]  }
   0x1   :  { %10 = vsyncpa [#allocation4 + $0x1], 0  ;;  %s1524_s12 = smov 0   ;;  %s1526_s13 = smov 0  }
   0x2   :  { %s1528_s14 = smov 0   ;;  %s1530_s15 = smov 0  }
   0x3   :  { %s1532_s16 = smov 0   ;;  %s1534_s17 = smov 0  }
   0x4 LB: > { %s1111_s18 = sadd.s32 4294967295, %s1498_s17   ;;  %s1112_s19 = sadd.s32 4294967294, %s1498_s17   ;;  %s1498_s17 = sphi %s1534_s17, %s16_s17   ;;  %s1494_s16 = sphi %s1532_s16, %s1920_s16   ;;  %s1490_s15 = sphi %s1530_s15, %s1919_s15   ;;  %s1486_s14 = sphi %s1528_s14, %s1918_s14   ;;  %s1482_s13 = sphi %s1526_s13, %s1917_s13   ;;  %s1478_s12 = sphi %s1524_s12, %s1916_s12  }
   0x5   : > { %s35_s20 = sadd.s32 1, %s1494_s16  ;;  %s126_s21 = sadd.s32 1, %s1486_s14 }
   0x6   : > { %p37_p0 = scmp.ge.s32.totalorder %s35_s20, 9  ;;  %p136_p1 = scmp.ne.s32.totalorder %s1486_s14, %s1482_s13 }
   0x7   : > { %p137_p2 = scmp.eq.s32.totalorder %s1111_s18, 8  ;;  %p142_p3 = scmp.ne.s32.totalorder %s1482_s13, %s1478_s12 }
   0x8   : > { %s1922_s20 = smov (%p37_p0, %s35_s20), 0  ;;  %p143_p5 = scmp.eq.s32.totalorder %s1112_s19, 8 }
   0x9   : > { %p1564_p4 = por %p137_p2, %p136_p1  ;;  %s121_s23 = ssub.s32 %s1494_s16, %s1922_s20 }
   0xa   : > { %p1117_p6 = scmp.ge.s32.totalorder %s1498_s17, 1  ;;  %p124_p7 = scmp.eq.s32.totalorder %s121_s23, 0 }
   0xb   : > { %p1571_p8 = por %p143_p5, %p142_p3  ;;  %p194_p9 = scmp.lt.s32.totalorder %s1498_s17, 10 }
   0xc   : > { %s1577_s25 = scalar_select %p124_p7, %s1486_s14, %s126_s21  }
   0xd   : > { %p195_p10 = pnand %p1117_p6, %p194_p9 }
   0xe   : > { %s1119_s30 = sshll.u32 (!%p195_p10), %s1490_s15, 5  ;;  %s231_s7 = sand.u32 (!%p195_p10), 1, %s1482_s13  }
   0xf   : > { %198 = sbr.rel (%p195_p10) target bundleno = 322 (0x142), region = 32  ;;  %p236_p11 = scmp.lt.s32.totalorder (!%p195_p10), %s1119_s30, 287 }
  0x10   : > { %s1349_s18 = sshll.u32 (!%p195_p10), %s1490_s15, 8  ;;  %s984_s27 = scalar_lea.sflag (!%p195_p10), [#allocation4], %s231_s7 }
  0x11   : > { %s996_s23 = scalar_lea.hbm (!%p195_p10), %s1913_s3, %s1349_s18  ;;  %s1440_s5 = scalar_lea.hbm (!%p195_p10), %s1913_s3, 2304 }
  0x12   : > { %s999_s26 = sshll.u32 (!%p195_p10), %s996_s23, 4  ;;  %s1000_s26 = int_to_ptr.hbm [resolvable:$true] %s999_s26 }
  0x13   : > { %s1434_s28 = sshra.s32 (!%p195_p10), %s1000_s26, 4  ;;  %s1435_s28 = int_to_ptr.hbm [resolvable:$true] %s1434_s28 }
  0x14   : > { %v1347_v0 = vld [vmem:[%s1911_s1 + $0x38] sm:$0xff]  ;;  %v379_v1 = vld [vmem:[%s1911_s1 + $0x48] sm:$0x3]  ;;  %vm630_vm0 = vcmask 1040384   ;;  %vm631_vm1 = vcmask 1041408   ;;  %v1346_v3 = vld [vmem:[%s1911_s1 + $0x30] sm:$0xff]  ;;  %p1441_p1 = scmp.lt.s32.totalorder %s1435_s28, %s1913_s3 }
  0x15   : > { %v561_v2 = vunpack.c.l.b16 %v379_v1  ;;  %637 = vmatpush.bf16.msra.mxu0 %v1347_v0  ;;  %1350 = vmatpush.bf16.msra.mxu2 %v1347_v0  ;;  %v1500_v4 = vmov 65535   ;;  %s1924_s30 = smov (!%p236_p11, %s1119_s30), 287  ;;  %v1345_v9 = vld [vmem:[%s1911_s1 + $0x28] sm:$0xff]  ;;  %v1348_v10 = vld [vmem:[%s1911_s1 + $0x40] sm:$0xff]  ;;  %vm581_vm2 = vcmask 154624   ;;  %v1343_v18 = vld [vmem:[%s1911_s1 + $0x18] sm:$0xff] }
  0x16   : > { %v632_v5 = vsel %vm630_vm0, 4294967295, %v1500_v4  ;;  %s1307_s8 = sshll.u32 %s1924_s30, 3  ;;  %v1344_v14 = vld [vmem:[%s1911_s1 + $0x20] sm:$0xff]  ;;  %v1342_v19 = vld [vmem:[%s1911_s1 + $0x10] sm:$0xff]  ;;  %v1341_v20 = vld [vmem:[%s1911_s1 + $0x8] sm:$0xff]  ;;  %vm264_vm3 = vcmask 523264  }
  0x17   : > { %v571_v6 = vpack.c.b16 %v561_v2, %v561_v2  ;;  %v633_v7 = vsel %vm631_vm1, %v632_v5, 0  ;;  %s1598_s19 = scalar_lea.vmem %s1910_s0, %s1307_s8  ;;  %v1340_v26 = vld [vmem:[%s1911_s1] sm:$0xff]  ;;  %s1118_s8 = sshll.u32 %s231_s7, 8 }
  0x18   : > { %v1308_v11 = vld [vmem:[%s1598_s19 + $0x4] sm:$0xf]  ;;  %v1126_v12 = vld [vmem:[%s1598_s19 + $0x8] sm:$0xf0]  ;;  %v1326_v15 = vld [vmem:[%s1598_s19 + $0x94] sm:$0xf] }
  0x19   : > { %v635_v8 = vand.u32 %v633_v7, %v571_v6  ;;  %638 = vmatpush.bf16.msra.mxu0 %v1346_v3  ;;  %1351 = vmatpush.bf16.msra.mxu2 %v1346_v3  ;;  %v1129_v13 = vor.u32 %v1308_v11, %v1126_v12  ;;  %v1198_v16 = vld [vmem:[%s1598_s19 + $0x98] sm:$0xf0]  ;;  %v1310_v21 = vld [vmem:[%s1598_s19 + $0x14] sm:$0xf]  ;;  %v1328_v23 = vld [vmem:[%s1598_s19 + $0xa4] sm:$0xf] }
  0x1a   : > { %v1201_v17 = vor.u32 %v1326_v15, %v1198_v16  ;;  %v1134_v22 = vld [vmem:[%s1598_s19 + $0x18] sm:$0xf0]  ;;  %v1206_v24 = vld [vmem:[%s1598_s19 + $0xa8] sm:$0xf0]  ;;  %v1124_v27 = vld [vmem:[%s1598_s19] sm:$0xf] }
  0x1b   : > { %732 = vmatpush.bf16.msra.mxu1 %v635_v8  ;;  %1358 = vmatpush.bf16.msra.mxu3 %v635_v8  ;;  %v1137_v25 = vor.u32 %v1310_v21, %v1134_v22  ;;  %v1309_v28 = vld [vmem:[%s1598_s19 + $0x4] sm:$0xf0]  ;;  %v1188_v29 = vld [vmem:[%s1598_s19 + $0x80] sm:$0xf]  ;;  %v1209_v31 = vor.u32 %v1328_v23, %v1206_v24  ;;  %v1312_v34 = vld [vmem:[%s1598_s19 + $0x24] sm:$0xf] }
  0x1c   : > { %v1325_v30 = vld [vmem:[%s1598_s19 + $0x84] sm:$0xf0]  ;;  %v1125_v32 = vor.u32 %v1309_v28, %v1124_v27  ;;  %v1142_v35 = vld [vmem:[%s1598_s19 + $0x28] sm:$0xf0]  ;;  %v1330_v36 = vld [vmem:[%s1598_s19 + $0xb4] sm:$0xf] }
  0x1d   : > { %639 = vmatpush.bf16.msra.mxu0 %v1345_v9  ;;  %1352 = vmatpush.bf16.msra.mxu2 %v1345_v9  ;;  %v1189_v33 = vor.u32 %v1325_v30, %v1188_v29  ;;  %v1214_v37 = vld [vmem:[%s1598_s19 + $0xb8] sm:$0xf0]  ;;  %v1145_v38 = vor.u32 %v1312_v34, %v1142_v35  ;;  %v1132_v39 = vld [vmem:[%s1598_s19 + $0x10] sm:$0xf]  ;;  %v1311_v40 = vld [vmem:[%s1598_s19 + $0x14] sm:$0xf0] }
  0x1e   : > { %v1196_v41 = vld [vmem:[%s1598_s19 + $0x90] sm:$0xf]  ;;  %v1327_v42 = vld [vmem:[%s1598_s19 + $0x94] sm:$0xf0]  ;;  %v1217_v43 = vor.u32 %v1330_v36, %v1214_v37  ;;  %v1133_v44 = vor.u32 %v1311_v40, %v1132_v39  ;;  %v1314_v46 = vld [vmem:[%s1598_s19 + $0x34] sm:$0xf] }
  0x1f   : > { %733 = vmatpush.bf16.msra.mxu1 %v1348_v10  ;;  %1359 = vmatpush.bf16.msra.mxu3 %v1348_v10  ;;  %v1197_v45 = vor.u32 %v1327_v42, %v1196_v41  ;;  %v1150_v47 = vld [vmem:[%s1598_s19 + $0x38] sm:$0xf0]  ;;  %v1332_v48 = vld [vmem:[%s1598_s19 + $0xc4] sm:$0xf]  ;;  %v1222_v49 = vld [vmem:[%s1598_s19 + $0xc8] sm:$0xf0] }
  0x20   : > { %v1153_v50 = vor.u32 %v1314_v46, %v1150_v47  ;;  %v1140_v51 = vld [vmem:[%s1598_s19 + $0x20] sm:$0xf]  ;;  %v1313_v52 = vld [vmem:[%s1598_s19 + $0x24] sm:$0xf0]  ;;  %v1225_v55 = vor.u32 %v1332_v48, %v1222_v49  ;;  %v1316_v58 = vld [vmem:[%s1598_s19 + $0x44] sm:$0xf] }
  0x21   : > { %640 = vmatpush.bf16.msra.mxu0 %v1344_v14  ;;  %1353 = vmatpush.bf16.msra.mxu2 %v1344_v14  ;;  %v1204_v53 = vld [vmem:[%s1598_s19 + $0xa0] sm:$0xf]  ;;  %v1329_v54 = vld [vmem:[%s1598_s19 + $0xa4] sm:$0xf0]  ;;  %v1141_v56 = vor.u32 %v1313_v52, %v1140_v51  ;;  %v1158_v59 = vld [vmem:[%s1598_s19 + $0x48] sm:$0xf0] }
  0x22   : > { %1286 = vmatmul.msk.bf16.vlgmr.msra.gmra.mxu1 %vm581_vm2, %v1129_v13  ;;  %1295 = vmatmul.msk.bf16.vlgmr.msra.gmra.mxu3 %vm581_vm2, %v1201_v17  ;;  %v1205_v57 = vor.u32 %v1329_v54, %v1204_v53  ;;  %v1334_v60 = vld [vmem:[%s1598_s19 + $0xd4] sm:$0xf]  ;;  %v1230_v61 = vld [vmem:[%s1598_s19 + $0xd8] sm:$0xf0]  ;;  %v1161_v62 = vor.u32 %v1316_v58, %v1158_v59  ;;  %v1148_v63 = vld [vmem:[%s1598_s19 + $0x30] sm:$0xf] }
  0x23   : > { %v1315_v0 = vld [vmem:[%s1598_s19 + $0x34] sm:$0xf0]  ;;  %v1212_v1 = vld [vmem:[%s1598_s19 + $0xb0] sm:$0xf]  ;;  %v1233_v3 = vor.u32 %v1334_v60, %v1230_v61  ;;  %v1318_v6 = vld [vmem:[%s1598_s19 + $0x54] sm:$0xf] }
  0x24   : > { %v1331_v2 = vld [vmem:[%s1598_s19 + $0xb4] sm:$0xf0]  ;;  %v1149_v4 = vor.u32 %v1315_v0, %v1148_v63  ;;  %v1166_v7 = vld [vmem:[%s1598_s19 + $0x58] sm:$0xf0]  ;;  %v1336_v8 = vld [vmem:[%s1598_s19 + $0xe4] sm:$0xf] }
  0x25   : > { %641 = vmatpush.bf16.msra.mxu0 %v1343_v18  ;;  %1354 = vmatpush.bf16.msra.mxu2 %v1343_v18  ;;  %v1213_v5 = vor.u32 %v1331_v2, %v1212_v1  ;;  %v1238_v9 = vld [vmem:[%s1598_s19 + $0xe8] sm:$0xf0]  ;;  %v1169_v10 = vor.u32 %v1318_v6, %v1166_v7  ;;  %v1156_v11 = vld [vmem:[%s1598_s19 + $0x40] sm:$0xf]  ;;  %v1317_v12 = vld [vmem:[%s1598_s19 + $0x44] sm:$0xf0] }
  0x26   : > { %v1220_v13 = vld [vmem:[%s1598_s19 + $0xc0] sm:$0xf]  ;;  %v1333_v14 = vld [vmem:[%s1598_s19 + $0xc4] sm:$0xf0]  ;;  %v1241_v15 = vor.u32 %v1336_v8, %v1238_v9  ;;  %v1157_v16 = vor.u32 %v1317_v12, %v1156_v11  ;;  %v1320_v18 = vld [vmem:[%s1598_s19 + $0x64] sm:$0xf] }
  0x27   : > { %v1221_v17 = vor.u32 %v1333_v14, %v1220_v13  ;;  %v1246_v21 = vld [vmem:[%s1598_s19 + $0xf8] sm:$0xf0]  ;;  %v1164_v23 = vld [vmem:[%s1598_s19 + $0x50] sm:$0xf]  ;;  %v1319_v24 = vld [vmem:[%s1598_s19 + $0x54] sm:$0xf0] }
  0x28   : > { %v1165_v28 = vor.u32 %v1319_v24, %v1164_v23  ;;  %v1322_v30 = vld [vmem:[%s1598_s19 + $0x74] sm:$0xf]  ;;  %v1321_v34 = vld [vmem:[%s1598_s19 + $0x64] sm:$0xf0]  ;;  %v1501_v35 = vmov 0.0   ;;  %s1740_s11 = scalar_lea.vmem [#allocation3], %s1118_s8 }
  0x29   : > { %642 = vmatpush.bf16.msra.mxu0 %v1342_v19  ;;  %1355 = vmatpush.bf16.msra.mxu2 %v1342_v19  ;;  %v1174_v19 = vld [vmem:[%s1598_s19 + $0x68] sm:$0xf0]  ;;  %265 = vst.msk [vmem:[#allocation2] sm:$0xff] %vm264_vm3, %v1501_v35  ;;  %v1236_v36 = vld [vmem:[%s1598_s19 + $0xe0] sm:$0xf]  ;;  %s997_s15 = sshll.u32 %s1740_s11, 4  ;;  %s998_s15 = int_to_ptr.vmem [resolvable:$true] %s997_s15 }
  0x2a   : > { %v1177_v22 = vor.u32 %v1320_v18, %v1174_v19  ;;  %v1337_v37 = vld [vmem:[%s1598_s19 + $0xe4] sm:$0xf0]  ;;  %266 = vst.msk [vmem:[#allocation2 + $0x8] sm:$0xff] %vm264_vm3, %v1501_v35  ;;  %v1324_v40 = vld [vmem:[%s1598_s19 + $0x84] sm:$0xf]  ;;  %s1436_s29 = scalar_lea.hbm %s1435_s28, 256 }
  0x2b   : > { %267 = vst.msk [vmem:[#allocation2 + $0x10] sm:$0xff] %vm264_vm3, %v1501_v35  ;;  %v1237_v39 = vor.u32 %v1337_v37, %v1236_v36  ;;  %v1190_v41 = vld [vmem:[%s1598_s19 + $0x88] sm:$0xf0]  ;;  %v1244_v46 = vld [vmem:[%s1598_s19 + $0xf0] sm:$0xf]  ;;  %p1437_p12 = scmp.ne.s32.totalorder %s1435_s28, %s1436_s29  ;;  %p1442_p2 = scmp.lt.s32.totalorder %s1440_s5, %s1436_s29 }
  0x2c   : > { %268 = vst.msk [vmem:[#allocation2 + $0x18] sm:$0xff] %vm264_vm3, %v1501_v35  ;;  %v1193_v42 = vor.u32 %v1324_v40, %v1190_v41  ;;  %v1339_v47 = vld [vmem:[%s1598_s19 + $0xf4] sm:$0xf0] }
  0x2d   : > { %643 = vmatpush.bf16.msra.mxu0 %v1341_v20  ;;  %1356 = vmatpush.bf16.msra.mxu2 %v1341_v20  ;;  %v1338_v20 = vld [vmem:[%s1598_s19 + $0xf4] sm:$0xf]  ;;  %269 = vst.msk [vmem:[#allocation2 + $0x20] sm:$0xff] %vm264_vm3, %v1501_v35  ;;  %v1245_v49 = vor.u32 %v1339_v47, %v1244_v46  ;;  %p1438_p13 = pnand %p1437_p12, %p1564_p4  ;;  %p1443_p3 = por %p1442_p2, %p1441_p1 }
  0x2e   : > { %v1249_v27 = vor.u32 %v1338_v20, %v1246_v21  ;;  %270 = vst.msk [vmem:[#allocation2 + $0x28] sm:$0xff] %vm264_vm3, %v1501_v35 }
  0x2f   : > { %271 = vst.msk [vmem:[#allocation2 + $0x30] sm:$0xff] %vm264_vm3, %v1501_v35  ;;  %p1439_p0 = pneg %p1438_p13 }
  0x30   : > { %272 = vst.msk [vmem:[#allocation2 + $0x38] sm:$0xff] %vm264_vm3, %v1501_v35  ;;  %v297_v53 = vld [vmem:[#allocation2] sm:$0xff] }
  0x31   : > { %644 = vmatpush.bf16.msra.mxu0 %v1340_v26  ;;  %1357 = vmatpush.bf16.msra.mxu2 %v1340_v26  ;;  %v1335_v26 = vld [vmem:[%s1598_s19 + $0xd4] sm:$0xf0]  ;;  %273 = vst.msk [vmem:[#allocation2 + $0x40] sm:$0xff] %vm264_vm3, %v1501_v35  ;;  %v298_v60 = vld [vmem:[#allocation2 + $0x8] sm:$0xff]  ;;  %p1444_p5 = pnand %p1443_p3, %p1439_p0 }
  0x32   : > { %1287 = vmatmul.msk.bf16.gmra.mxu1 %vm581_vm2, %v1137_v25  ;;  %1296 = vmatmul.msk.bf16.gmra.mxu3 %vm581_vm2, %v1209_v31  ;;  %v1228_v25 = vld [vmem:[%s1598_s19 + $0xd0] sm:$0xf]  ;;  %v1182_v31 = vld [vmem:[%s1598_s19 + $0x78] sm:$0xf0]  ;;  %274 = vst.msk [vmem:[#allocation2 + $0x48] sm:$0xff] %vm264_vm3, %v1501_v35 }
  0x33   : > { %v1229_v29 = vor.u32 %v1335_v26, %v1228_v25  ;;  %275 = vst.msk [vmem:[#allocation2 + $0x50] sm:$0xff] %vm264_vm3, %v1501_v35 }
  0x34   : > { %645 = vmatmul.bf16.vlgmr.msra.gmra.mxu0 %v1125_v32  ;;  %685 = vmatmul.bf16.vlgmr.msra.gmra.mxu2 %v1189_v33  ;;  %v1185_v32 = vor.u32 %v1322_v30, %v1182_v31  ;;  %v1172_v33 = vld [vmem:[%s1598_s19 + $0x60] sm:$0xf]  ;;  %276 = vst.msk [vmem:[#allocation2 + $0x58] sm:$0xff] %vm264_vm3, %v1501_v35 }
  0x35   : > { %277 = vst.msk [vmem:[#allocation2 + $0x60] sm:$0xff] %vm264_vm3, %v1501_v35 }
  0x36   : > { %278 = vst.msk [vmem:[#allocation2 + $0x68] sm:$0xff] %vm264_vm3, %v1501_v35 }
  0x37   : > { %279 = vst.msk [vmem:[#allocation2 + $0x70] sm:$0xff] %vm264_vm3, %v1501_v35 }
  0x38   : > { %280 = vst.msk [vmem:[#allocation2 + $0x78] sm:$0xff] %vm264_vm3, %v1501_v35 }
  0x39   : > { %281 = vst.msk [vmem:[#allocation2 + $0x80] sm:$0xff] %vm264_vm3, %v1501_v35 }
  0x3a   : > { %282 = vst.msk [vmem:[#allocation2 + $0x88] sm:$0xff] %vm264_vm3, %v1501_v35 }
  0x3b   : > { %283 = vst.msk [vmem:[#allocation2 + $0x90] sm:$0xff] %vm264_vm3, %v1501_v35 }
  0x3c   : > { %284 = vst.msk [vmem:[#allocation2 + $0x98] sm:$0xff] %vm264_vm3, %v1501_v35 }
  0x3d   : > { %285 = vst.msk [vmem:[#allocation2 + $0xa0] sm:$0xff] %vm264_vm3, %v1501_v35 }
  0x3e   : > { %286 = vst.msk [vmem:[#allocation2 + $0xa8] sm:$0xff] %vm264_vm3, %v1501_v35 }
  0x3f   : > { %287 = vst.msk [vmem:[#allocation2 + $0xb0] sm:$0xff] %vm264_vm3, %v1501_v35 }
  0x40   : > { %288 = vst.msk [vmem:[#allocation2 + $0xb8] sm:$0xff] %vm264_vm3, %v1501_v35 }
  0x41   : > { %289 = vst.msk [vmem:[#allocation2 + $0xc0] sm:$0xff] %vm264_vm3, %v1501_v35 }
  0x42   : > { %1288 = vmatmul.msk.bf16.gmra.mxu1 %vm581_vm2, %v1145_v38  ;;  %1297 = vmatmul.msk.bf16.gmra.mxu3 %vm581_vm2, %v1217_v43  ;;  %v1173_v38 = vor.u32 %v1321_v34, %v1172_v33  ;;  %v1180_v43 = vld [vmem:[%s1598_s19 + $0x70] sm:$0xf]  ;;  %290 = vst.msk [vmem:[#allocation2 + $0xc8] sm:$0xff] %vm264_vm3, %v1501_v35 }
  0x43   : > { %291 = vst.msk [vmem:[#allocation2 + $0xd0] sm:$0xff] %vm264_vm3, %v1501_v35  ;;  %v315_v13 = vld [vmem:[#allocation2 + $0x90] sm:$0xff]  ;;  %v316_v25 = vld [vmem:[#allocation2 + $0x98] sm:$0xff] }
  0x44   : > { %650 = vmatmul.bf16.gmra.mxu0 %v1133_v44  ;;  %690 = vmatmul.bf16.gmra.mxu2 %v1197_v45  ;;  %v1323_v44 = vld [vmem:[%s1598_s19 + $0x74] sm:$0xf0]  ;;  %292 = vst.msk [vmem:[#allocation2 + $0xd8] sm:$0xff] %vm264_vm3, %v1501_v35 }
  0x45   : > { %v1181_v48 = vor.u32 %v1323_v44, %v1180_v43  ;;  %293 = vst.msk [vmem:[#allocation2 + $0xe0] sm:$0xff] %vm264_vm3, %v1501_v35 }
  0x46   : > { %294 = vst.msk [vmem:[#allocation2 + $0xe8] sm:$0xff] %vm264_vm3, %v1501_v35 }
  0x47   : > { %295 = vst.msk [vmem:[#allocation2 + $0xf0] sm:$0xff] %vm264_vm3, %v1501_v35 }
  0x48   : > { %296 = vst.msk [vmem:[#allocation2 + $0xf8] sm:$0xff] %vm264_vm3, %v1501_v35 }
  0x52   : > { %1289 = vmatmul.msk.bf16.gmra.mxu1 %vm581_vm2, %v1153_v50  ;;  %1298 = vmatmul.msk.bf16.gmra.mxu3 %vm581_vm2, %v1225_v55 }
  0x54   : > { %655 = vmatmul.bf16.gmra.mxu0 %v1141_v56  ;;  %695 = vmatmul.bf16.gmra.mxu2 %v1205_v57 }
  0x62   : > { %1290 = vmatmul.msk.bf16.gmra.mxu1 %vm581_vm2, %v1161_v62  ;;  %1299 = vmatmul.msk.bf16.gmra.mxu3 %vm581_vm2, %v1233_v3  ;;  %v1736_v62 = vld [vmem:[%s1912_s2] ss:$0 sm:$0xff] }
  0x64   : > { %660 = vmatmul.bf16.gmra.mxu0 %v1149_v4  ;;  %700 = vmatmul.bf16.gmra.mxu2 %v1213_v5  ;;  %v299_v5 = vld [vmem:[#allocation2 + $0x10] sm:$0xff] }
  0x72   : > { %1291 = vmatmul.msk.bf16.gmra.mxu1 %vm581_vm2, %v1169_v10  ;;  %1300 = vmatmul.msk.bf16.gmra.mxu3 %vm581_vm2, %v1241_v15 }
  0x74   : > { %665 = vmatmul.bf16.gmra.mxu0 %v1157_v16  ;;  %705 = vmatmul.bf16.gmra.mxu2 %v1221_v17  ;;  %v300_v16 = vld [vmem:[#allocation2 + $0x18] sm:$0xff] }
  0x82   : > { %1292 = vmatmul.msk.bf16.gmra.mxu1 %vm581_vm2, %v1177_v22  ;;  %1301 = vmatmul.msk.bf16.gmra.mxu3 %vm581_vm2, %v1249_v27 }
  0x84   : > { %670 = vmatmul.bf16.gmra.mxu0 %v1165_v28  ;;  %710 = vmatmul.bf16.gmra.mxu2 %v1229_v29  ;;  %v301_v28 = vld [vmem:[#allocation2 + $0x20] sm:$0xff] }
  0x92   : > { %1293 = vmatmul.msk.bf16.gmra.mxu1 %vm581_vm2, %v1185_v32 }
  0x94   : > { %675 = vmatmul.bf16.gmra.mxu0 %v1173_v38  ;;  %715 = vmatmul.bf16.gmra.mxu2 %v1237_v39  ;;  %v317_v39 = vld [vmem:[#allocation2 + $0xa0] sm:$0xff] }
  0x9f   : > { %v735_v45 = vpop.f32.mrf.mxu1 }
  0xa2   : > { %1294 = vmatmul.msk.bf16.gmra.mxu1 %vm581_vm2, %v1193_v42  ;;  %v302_v42 = vld [vmem:[#allocation2 + $0x28] sm:$0xff] }
  0xa4   : > { %680 = vmatmul.bf16.gmra.mxu0 %v1181_v48  ;;  %720 = vmatmul.bf16.gmra.mxu2 %v1245_v49 }
  0xa5   : > { %v780_v52 = vpop.f32.mrf.mxu3 }
  0xa7   : > { %v737_v50 = vpop.f32.mrf.mxu1 }
  0xad   : > { %v782_v59 = vpop.f32.mrf.mxu3 }
  0xaf   : > { %v740_v51 = vpop.f32.mrf.mxu1 }
  0xb1   : > { %v646_v54 = vpop.f32.mrf.mxu0 }
  0xb2   : > { %v736_v55 = vadd.f32 %v735_v45, %v646_v54 }
  0xb4   : > { %v815_v56 = vadd.f32 %v736_v55, %v297_v53 }
  0xb5   : > { %v785_v8 = vpop.f32.mrf.mxu3 }
  0xb6   : > { %848 = vst.msk [vmem:[#allocation2] sm:$0xff] %vm264_vm3, %v815_v56  ;;  %v303_v56 = vld [vmem:[#allocation2 + $0x30] sm:$0xff] }
  0xb7   : > { %v742_v57 = vpop.f32.mrf.mxu1  ;;  %v1729_v58 = vpop.f32.mrf.mxu2 }
  0xb9   : > { %v648_v61 = vpop.f32.mrf.mxu0 }
  0xba   : > { %v738_v63 = vadd.f32 %v737_v50, %v648_v61 }
  0xbc   : > { %v816_v0 = vadd.f32 %v738_v63, %v298_v60 }
  0xbd   : > { %v883_v1 = vld [vmem:[#allocation2] sm:$0xff]  ;;  %v787_v21 = vpop.f32.mrf.mxu3 }
  0xbe   : > { %v919_v2 = vadd.f32 %v1736_v62, %v883_v1  ;;  %849 = vst.msk [vmem:[#allocation2 + $0x8] sm:$0xff] %vm264_vm3, %v816_v0 }
  0xbf   : > { %v745_v3 = vpop.f32.mrf.mxu1  ;;  %v1744_v4 = vpop.f32.mrf.mxu2 }
  0xc0   : > { %951 = vst.msk [vmem:[%s1740_s11] sm:$0xff] %vm264_vm3, %v919_v2 }
  0xc1   : > { %v651_v6 = vpop.f32.mrf.mxu0 }
  0xc2   : > { %v741_v7 = vadd.f32 %v740_v51, %v651_v6 }
  0xc4   : > { %v817_v9 = vadd.f32 %v741_v7, %v299_v5  ;;  %v319_v5 = vld [vmem:[#allocation2 + $0xb0] sm:$0xff] }
  0xc5   : > { %v884_v10 = vld [vmem:[#allocation2 + $0x8] sm:$0xff]  ;;  %v790_v38 = vpop.f32.mrf.mxu3 }
  0xc6   : > { %v920_v11 = vadd.f32 %v1736_v62, %v884_v10  ;;  %850 = vst.msk [vmem:[#allocation2 + $0x10] sm:$0xff] %vm264_vm3, %v817_v9 }
  0xc7   : > { %v747_v12 = vpop.f32.mrf.mxu1  ;;  %v691_v14 = vpop.f32.mrf.mxu2 }
  0xc8   : > { %952 = vst.msk [vmem:[%s1740_s11 + $0x8] sm:$0xff] %vm264_vm3, %v920_v11  ;;  %v781_v15 = vadd.f32 %v780_v52, %v691_v14  ;;  %v318_v52 = vld [vmem:[#allocation2 + $0xa8] sm:$0xff] }
  0xc9   : > { %v653_v17 = vpop.f32.mrf.mxu0 }
  0xca   : > { %v743_v18 = vadd.f32 %v742_v57, %v653_v17  ;;  %v833_v19 = vadd.f32 %v781_v15, %v315_v13 }
  0xcc   : > { %v818_v20 = vadd.f32 %v743_v18, %v300_v16  ;;  %866 = vst.msk [vmem:[#allocation2 + $0x90] sm:$0xff] %vm264_vm3, %v833_v19  ;;  %v320_v19 = vld [vmem:[#allocation2 + $0xb8] sm:$0xff] }
  0xcd   : > { %v885_v22 = vld [vmem:[#allocation2 + $0x10] sm:$0xff]  ;;  %v792_v54 = vpop.f32.mrf.mxu3 }
  0xce   : > { %v921_v23 = vadd.f32 %v1736_v62, %v885_v22  ;;  %851 = vst.msk [vmem:[#allocation2 + $0x18] sm:$0xff] %vm264_vm3, %v818_v20  ;;  %v305_v22 = vld [vmem:[#allocation2 + $0x40] sm:$0xff] }
  0xcf   : > { %v750_v24 = vpop.f32.mrf.mxu1  ;;  %v693_v26 = vpop.f32.mrf.mxu2 }
  0xd0   : > { %953 = vst.msk [vmem:[%s1740_s11 + $0x10] sm:$0xff] %vm264_vm3, %v921_v23  ;;  %v783_v27 = vadd.f32 %v782_v59, %v693_v26 }
  0xd1   : > { %v656_v29 = vpop.f32.mrf.mxu0 }
  0xd2   : > { %v746_v30 = vadd.f32 %v745_v3, %v656_v29  ;;  %v834_v31 = vadd.f32 %v783_v27, %v316_v25 }
  0xd3   : > { %v901_v32 = vld [vmem:[#allocation2 + $0x90] sm:$0xff] }
  0xd4   : > { %v819_v33 = vadd.f32 %v746_v30, %v301_v28  ;;  %v937_v34 = vadd.f32 %v1736_v62, %v901_v32  ;;  %867 = vst.msk [vmem:[#allocation2 + $0x98] sm:$0xff] %vm264_vm3, %v834_v31 }
  0xd5   : > { %v886_v35 = vld [vmem:[#allocation2 + $0x18] sm:$0xff]  ;;  %v795_v11 = vpop.f32.mrf.mxu3 }
  0xd6   : > { %v922_v36 = vadd.f32 %v1736_v62, %v886_v35  ;;  %852 = vst.msk [vmem:[#allocation2 + $0x20] sm:$0xff] %vm264_vm3, %v819_v33  ;;  %v321_v33 = vld [vmem:[#allocation2 + $0xc0] sm:$0xff] }
  0xd7   : > { %v752_v37 = vpop.f32.mrf.mxu1  ;;  %969 = vst.msk [vmem:[%s1740_s11 + $0x90] sm:$0xff] %vm264_vm3, %v937_v34  ;;  %v696_v40 = vpop.f32.mrf.mxu2 }
  0xd8   : > { %954 = vst.msk [vmem:[%s1740_s11 + $0x18] sm:$0xff] %vm264_vm3, %v922_v36  ;;  %v786_v41 = vadd.f32 %v785_v8, %v696_v40  ;;  %v304_v8 = vld [vmem:[#allocation2 + $0x38] sm:$0xff]  ;;  %v306_v36 = vld [vmem:[#allocation2 + $0x48] sm:$0xff] }
  0xd9   : > { %v658_v43 = vpop.f32.mrf.mxu0 }
  0xda   : > { %v748_v44 = vadd.f32 %v747_v12, %v658_v43  ;;  %v835_v45 = vadd.f32 %v786_v41, %v317_v39 }
  0xdb   : > { %v902_v46 = vld [vmem:[#allocation2 + $0x98] sm:$0xff] }
  0xdc   : > { %v820_v47 = vadd.f32 %v748_v44, %v302_v42  ;;  %v938_v48 = vadd.f32 %v1736_v62, %v902_v46  ;;  %868 = vst.msk [vmem:[#allocation2 + $0xa0] sm:$0xff] %vm264_vm3, %v835_v45 }
  0xdd   : > { %v887_v49 = vld [vmem:[#allocation2 + $0x20] sm:$0xff]  ;;  %v797_v28 = vpop.f32.mrf.mxu3 }
  0xde   : > { %v923_v50 = vadd.f32 %v1736_v62, %v887_v49  ;;  %853 = vst.msk [vmem:[#allocation2 + $0x28] sm:$0xff] %vm264_vm3, %v820_v47  ;;  %v322_v47 = vld [vmem:[#allocation2 + $0xc8] sm:$0xff] }
  0xdf   : > { %v755_v51 = vpop.f32.mrf.mxu1  ;;  %970 = vst.msk [vmem:[%s1740_s11 + $0x98] sm:$0xff] %vm264_vm3, %v938_v48  ;;  %v698_v53 = vpop.f32.mrf.mxu2 }
  0xe0   : > { %955 = vst.msk [vmem:[%s1740_s11 + $0x20] sm:$0xff] %vm264_vm3, %v923_v50  ;;  %v788_v55 = vadd.f32 %v787_v21, %v698_v53  ;;  %v307_v50 = vld [vmem:[#allocation2 + $0x50] sm:$0xff] }
  0xe1   : > { %v661_v57 = vpop.f32.mrf.mxu0 }
  0xe2   : > { %v751_v59 = vadd.f32 %v750_v24, %v661_v57  ;;  %v836_v60 = vadd.f32 %v788_v55, %v318_v52 }
  0xe3   : > { %v903_v61 = vld [vmem:[#allocation2 + $0xa0] sm:$0xff] }
  0xe4   : > { %v821_v63 = vadd.f32 %v751_v59, %v303_v56  ;;  %v939_v0 = vadd.f32 %v1736_v62, %v903_v61  ;;  %869 = vst.msk [vmem:[#allocation2 + $0xa8] sm:$0xff] %vm264_vm3, %v836_v60  ;;  %v323_v61 = vld [vmem:[#allocation2 + $0xd0] sm:$0xff] }
  0xe5   : > { %v888_v1 = vld [vmem:[#allocation2 + $0x28] sm:$0xff]  ;;  %v800_v46 = vpop.f32.mrf.mxu3 }
  0xe6   : > { %v924_v2 = vadd.f32 %v1736_v62, %v888_v1  ;;  %854 = vst.msk [vmem:[#allocation2 + $0x30] sm:$0xff] %vm264_vm3, %v821_v63 }
  0xe7   : > { %v757_v3 = vpop.f32.mrf.mxu1  ;;  %971 = vst.msk [vmem:[%s1740_s11 + $0xa0] sm:$0xff] %vm264_vm3, %v939_v0  ;;  %v701_v6 = vpop.f32.mrf.mxu2 }
  0xe8   : > { %956 = vst.msk [vmem:[%s1740_s11 + $0x28] sm:$0xff] %vm264_vm3, %v924_v2  ;;  %v791_v7 = vadd.f32 %v790_v38, %v701_v6  ;;  %v308_v2 = vld [vmem:[#allocation2 + $0x58] sm:$0xff] }
  0xe9   : > { %v663_v9 = vpop.f32.mrf.mxu0 }
  0xea   : > { %v753_v10 = vadd.f32 %v752_v37, %v663_v9  ;;  %v837_v12 = vadd.f32 %v791_v7, %v319_v5 }
  0xeb   : > { %v904_v13 = vld [vmem:[#allocation2 + $0xa8] sm:$0xff] }
  0xec   : > { %v822_v14 = vadd.f32 %v753_v10, %v304_v8  ;;  %v940_v15 = vadd.f32 %v1736_v62, %v904_v13  ;;  %870 = vst.msk [vmem:[#allocation2 + $0xb0] sm:$0xff] %vm264_vm3, %v837_v12  ;;  %v324_v13 = vld [vmem:[#allocation2 + $0xd8] sm:$0xff] }
  0xed   : > { %v889_v16 = vld [vmem:[#allocation2 + $0x30] sm:$0xff]  ;;  %v802_v0 = vpop.f32.mrf.mxu3 }
  0xee   : > { %v925_v17 = vadd.f32 %v1736_v62, %v889_v16  ;;  %855 = vst.msk [vmem:[#allocation2 + $0x38] sm:$0xff] %vm264_vm3, %v822_v14  ;;  %v309_v16 = vld [vmem:[#allocation2 + $0x60] sm:$0xff] }
  0xef   : > { %v760_v18 = vpop.f32.mrf.mxu1  ;;  %972 = vst.msk [vmem:[%s1740_s11 + $0xa8] sm:$0xff] %vm264_vm3, %v940_v15  ;;  %v703_v20 = vpop.f32.mrf.mxu2 }
  0xf0   : > { %957 = vst.msk [vmem:[%s1740_s11 + $0x30] sm:$0xff] %vm264_vm3, %v925_v17  ;;  %v793_v21 = vadd.f32 %v792_v54, %v703_v20 }
  0xf1   : > { %v666_v23 = vpop.f32.mrf.mxu0 }
  0xf2   : > { %v756_v24 = vadd.f32 %v755_v51, %v666_v23  ;;  %v838_v25 = vadd.f32 %v793_v21, %v320_v19 }
  0xf3   : > { %v905_v26 = vld [vmem:[#allocation2 + $0xb0] sm:$0xff] }
  0xf4   : > { %v823_v27 = vadd.f32 %v756_v24, %v305_v22  ;;  %v941_v29 = vadd.f32 %v1736_v62, %v905_v26  ;;  %871 = vst.msk [vmem:[#allocation2 + $0xb8] sm:$0xff] %vm264_vm3, %v838_v25 }
  0xf5   : > { %v890_v30 = vld [vmem:[#allocation2 + $0x38] sm:$0xff] }
  0xf6   : > { %v926_v31 = vadd.f32 %v1736_v62, %v890_v30  ;;  %856 = vst.msk [vmem:[#allocation2 + $0x40] sm:$0xff] %vm264_vm3, %v823_v27  ;;  %v325_v27 = vld [vmem:[#allocation2 + $0xe0] sm:$0xff]  ;;  %v310_v30 = vld [vmem:[#allocation2 + $0x68] sm:$0xff] }
  0xf7   : > { %v762_v32 = vpop.f32.mrf.mxu1  ;;  %973 = vst.msk [vmem:[%s1740_s11 + $0xb0] sm:$0xff] %vm264_vm3, %v941_v29  ;;  %v706_v34 = vpop.f32.mrf.mxu2 }
  0xf8   : > { %958 = vst.msk [vmem:[%s1740_s11 + $0x38] sm:$0xff] %vm264_vm3, %v926_v31  ;;  %v796_v35 = vadd.f32 %v795_v11, %v706_v34 }
  0xf9   : > { %v668_v37 = vpop.f32.mrf.mxu0 }
  0xfa   : > { %v758_v38 = vadd.f32 %v757_v3, %v668_v37  ;;  %v839_v39 = vadd.f32 %v796_v35, %v321_v33 }
  0xfb   : > { %v906_v40 = vld [vmem:[#allocation2 + $0xb8] sm:$0xff] }
  0xfc   : > { %v824_v41 = vadd.f32 %v758_v38, %v306_v36  ;;  %v942_v42 = vadd.f32 %v1736_v62, %v906_v40  ;;  %872 = vst.msk [vmem:[#allocation2 + $0xc0] sm:$0xff] %vm264_vm3, %v839_v39  ;;  %v313_v40 = vld [vmem:[#allocation2 + $0x80] sm:$0xff] }
  0xfd   : > { %v891_v43 = vld [vmem:[#allocation2 + $0x40] sm:$0xff] }
  0xfe   : > { %v927_v44 = vadd.f32 %v1736_v62, %v891_v43  ;;  %857 = vst.msk [vmem:[#allocation2 + $0x48] sm:$0xff] %vm264_vm3, %v824_v41  ;;  %v326_v43 = vld [vmem:[#allocation2 + $0xe8] sm:$0xff] }
  0xff   : > { %v765_v45 = vpop.f32.mrf.mxu1  ;;  %974 = vst.msk [vmem:[%s1740_s11 + $0xb8] sm:$0xff] %vm264_vm3, %v942_v42  ;;  %v708_v48 = vpop.f32.mrf.mxu2 }
 0x100   : > { %959 = vst.msk [vmem:[%s1740_s11 + $0x40] sm:$0xff] %vm264_vm3, %v927_v44  ;;  %v798_v49 = vadd.f32 %v797_v28, %v708_v48 }
 0x101   : > { %v671_v51 = vpop.f32.mrf.mxu0 }
 0x102   : > { %v761_v52 = vadd.f32 %v760_v18, %v671_v51  ;;  %v840_v53 = vadd.f32 %v798_v49, %v322_v47  ;;  %v805_v18 = vpop.f32.mrf.mxu3  ;;  %v311_v47 = vld [vmem:[#allocation2 + $0x70] sm:$0xff] }
 0x103   : > { %v907_v54 = vld [vmem:[#allocation2 + $0xc0] sm:$0xff] }
 0x104   : > { %v825_v55 = vadd.f32 %v761_v52, %v307_v50  ;;  %v943_v56 = vadd.f32 %v1736_v62, %v907_v54  ;;  %873 = vst.msk [vmem:[#allocation2 + $0xc8] sm:$0xff] %vm264_vm3, %v840_v53 }
 0x105   : > { %v892_v57 = vld [vmem:[#allocation2 + $0x48] sm:$0xff] }
 0x106   : > { %v928_v59 = vadd.f32 %v1736_v62, %v892_v57  ;;  %858 = vst.msk [vmem:[#allocation2 + $0x50] sm:$0xff] %vm264_vm3, %v825_v55 }
 0x107   : > { %v767_v60 = vpop.f32.mrf.mxu1  ;;  %975 = vst.msk [vmem:[%s1740_s11 + $0xc0] sm:$0xff] %vm264_vm3, %v943_v56  ;;  %v711_v63 = vpop.f32.mrf.mxu2  ;;  %v314_v56 = vld [vmem:[#allocation2 + $0x88] sm:$0xff] }
 0x108   : > { %960 = vst.msk [vmem:[%s1740_s11 + $0x48] sm:$0xff] %vm264_vm3, %v928_v59  ;;  %v801_v1 = vadd.f32 %v800_v46, %v711_v63 }
 0x109   : > { %v673_v3 = vpop.f32.mrf.mxu0 }
 0x10a   : > { %v763_v5 = vadd.f32 %v762_v32, %v673_v3  ;;  %v841_v6 = vadd.f32 %v801_v1, %v323_v61  ;;  %v807_v35 = vpop.f32.mrf.mxu3  ;;  %v312_v3 = vld [vmem:[#allocation2 + $0x78] sm:$0xff] }
 0x10b   : > { %v908_v7 = vld [vmem:[#allocation2 + $0xc8] sm:$0xff] }
 0x10c   : > { %v826_v8 = vadd.f32 %v763_v5, %v308_v2  ;;  %v944_v9 = vadd.f32 %v1736_v62, %v908_v7  ;;  %874 = vst.msk [vmem:[#allocation2 + $0xd0] sm:$0xff] %vm264_vm3, %v841_v6 }
 0x10d   : > { %v893_v10 = vld [vmem:[#allocation2 + $0x50] sm:$0xff] }
 0x10e   : > { %v929_v11 = vadd.f32 %v1736_v62, %v893_v10  ;;  %859 = vst.msk [vmem:[#allocation2 + $0x58] sm:$0xff] %vm264_vm3, %v826_v8 }
 0x10f   : > { %v770_v12 = vpop.f32.mrf.mxu1  ;;  %976 = vst.msk [vmem:[%s1740_s11 + $0xc8] sm:$0xff] %vm264_vm3, %v944_v9  ;;  %v713_v14 = vpop.f32.mrf.mxu2 }
 0x110   : > { %961 = vst.msk [vmem:[%s1740_s11 + $0x50] sm:$0xff] %vm264_vm3, %v929_v11  ;;  %v803_v15 = vadd.f32 %v802_v0, %v713_v14 }
 0x111   : > { %v676_v17 = vpop.f32.mrf.mxu0 }
 0x112   : > { %v766_v19 = vadd.f32 %v765_v45, %v676_v17  ;;  %v842_v20 = vadd.f32 %v803_v15, %v324_v13  ;;  %v810_v55 = vpop.f32.mrf.mxu3  ;;  %v328_v13 = vld [vmem:[#allocation2 + $0xf8] sm:$0xff] }
 0x113   : > { %v909_v21 = vld [vmem:[#allocation2 + $0xd0] sm:$0xff] }
 0x114   : > { %v827_v22 = vadd.f32 %v766_v19, %v309_v16  ;;  %v945_v23 = vadd.f32 %v1736_v62, %v909_v21  ;;  %875 = vst.msk [vmem:[#allocation2 + $0xd8] sm:$0xff] %vm264_vm3, %v842_v20 }
 0x115   : > { %v894_v24 = vld [vmem:[#allocation2 + $0x58] sm:$0xff] }
 0x116   : > { %v930_v25 = vadd.f32 %v1736_v62, %v894_v24  ;;  %860 = vst.msk [vmem:[#allocation2 + $0x60] sm:$0xff] %vm264_vm3, %v827_v22 }
 0x117   : > { %v772_v26 = vpop.f32.mrf.mxu1  ;;  %977 = vst.msk [vmem:[%s1740_s11 + $0xd0] sm:$0xff] %vm264_vm3, %v945_v23  ;;  %v716_v28 = vpop.f32.mrf.mxu2 }
 0x118   : > { %962 = vst.msk [vmem:[%s1740_s11 + $0x58] sm:$0xff] %vm264_vm3, %v930_v25  ;;  %v806_v29 = vadd.f32 %v805_v18, %v716_v28 }
 0x119   : > { %v678_v31 = vpop.f32.mrf.mxu0 }
 0x11a   : > { %v768_v32 = vadd.f32 %v767_v60, %v678_v31  ;;  %v843_v33 = vadd.f32 %v806_v29, %v325_v27  ;;  %v327_v60 = vld [vmem:[#allocation2 + $0xf0] sm:$0xff] }
 0x11b   : > { %v910_v34 = vld [vmem:[#allocation2 + $0xd8] sm:$0xff] }
 0x11c   : > { %v828_v36 = vadd.f32 %v768_v32, %v310_v30  ;;  %v946_v37 = vadd.f32 %v1736_v62, %v910_v34  ;;  %876 = vst.msk [vmem:[#allocation2 + $0xe0] sm:$0xff] %vm264_vm3, %v843_v33 }
 0x11d   : > { %v895_v38 = vld [vmem:[#allocation2 + $0x60] sm:$0xff] }
 0x11e   : > { %v931_v39 = vadd.f32 %v1736_v62, %v895_v38  ;;  %861 = vst.msk [vmem:[#allocation2 + $0x68] sm:$0xff] %vm264_vm3, %v828_v36 }
 0x11f   : > { %v775_v41 = vpop.f32.mrf.mxu1  ;;  %978 = vst.msk [vmem:[%s1740_s11 + $0xd8] sm:$0xff] %vm264_vm3, %v946_v37  ;;  %v718_v44 = vpop.f32.mrf.mxu2 }
 0x120   : > { %v776_v42 = vadd.f32 %v775_v41, %v1729_v58  ;;  %963 = vst.msk [vmem:[%s1740_s11 + $0x60] sm:$0xff] %vm264_vm3, %v931_v39  ;;  %v808_v46 = vadd.f32 %v807_v35, %v718_v44 }
 0x121   : > { %v681_v48 = vpop.f32.mrf.mxu0 }
 0x122   : > { %v831_v45 = vadd.f32 %v776_v42, %v313_v40  ;;  %v771_v49 = vadd.f32 %v770_v12, %v681_v48  ;;  %v844_v50 = vadd.f32 %v808_v46, %v326_v43  ;;  %v812_v12 = vpop.f32.mrf.mxu3 }
 0x123   : > { %v911_v51 = vld [vmem:[#allocation2 + $0xe0] sm:$0xff] }
 0x124   : > { %864 = vst.msk [vmem:[#allocation2 + $0x80] sm:$0xff] %vm264_vm3, %v831_v45  ;;  %v829_v52 = vadd.f32 %v771_v49, %v311_v47  ;;  %v947_v53 = vadd.f32 %v1736_v62, %v911_v51 }
 0x125   : > { %v896_v54 = vld [vmem:[#allocation2 + $0x68] sm:$0xff]  ;;  %877 = vst.msk [vmem:[#allocation2 + $0xe8] sm:$0xff] %vm264_vm3, %v844_v50 }
 0x126   : > { %v932_v58 = vadd.f32 %v1736_v62, %v896_v54  ;;  %862 = vst.msk [vmem:[#allocation2 + $0x70] sm:$0xff] %vm264_vm3, %v829_v52 }
 0x127   : > { %v777_v57 = vpop.f32.mrf.mxu1  ;;  %979 = vst.msk [vmem:[%s1740_s11 + $0xe0] sm:$0xff] %vm264_vm3, %v947_v53  ;;  %v721_v61 = vpop.f32.mrf.mxu2 }
 0x128   : > { %v778_v59 = vadd.f32 %v777_v57, %v1744_v4  ;;  %964 = vst.msk [vmem:[%s1740_s11 + $0x68] sm:$0xff] %vm264_vm3, %v932_v58  ;;  %v811_v0 = vadd.f32 %v810_v55, %v721_v61 }
 0x129   : > { %v683_v1 = vpop.f32.mrf.mxu0 }
 0x12a   : > { %v832_v63 = vadd.f32 %v778_v59, %v314_v56  ;;  %v773_v5 = vadd.f32 %v772_v26, %v683_v1  ;;  %v845_v7 = vadd.f32 %v811_v0, %v327_v60 }
 0x12b   : > { %v899_v2 = vld [vmem:[#allocation2 + $0x80] sm:$0xff] }
 0x12c   : > { %v935_v6 = vadd.f32 %v1736_v62, %v899_v2  ;;  %865 = vst.msk [vmem:[#allocation2 + $0x88] sm:$0xff] %vm264_vm3, %v832_v63  ;;  %v912_v8 = vld [vmem:[#allocation2 + $0xe8] sm:$0xff]  ;;  %v830_v10 = vadd.f32 %v773_v5, %v312_v3 }
 0x12d   : > { %v948_v4 = vadd.f32 %v1736_v62, %v912_v8  ;;  %v897_v9 = vld [vmem:[#allocation2 + $0x70] sm:$0xff]  ;;  %878 = vst.msk [vmem:[#allocation2 + $0xf0] sm:$0xff] %vm264_vm3, %v845_v7 }
 0x12e   : > { %967 = vst.msk [vmem:[%s1740_s11 + $0x80] sm:$0xff] %vm264_vm3, %v935_v6  ;;  %v933_v11 = vadd.f32 %v1736_v62, %v897_v9 }
 0x12f   : > { %980 = vst.msk [vmem:[%s1740_s11 + $0xe8] sm:$0xff] %vm264_vm3, %v948_v4  ;;  %v723_v14 = vpop.f32.mrf.mxu2 }
 0x130   : > { %965 = vst.msk [vmem:[%s1740_s11 + $0x70] sm:$0xff] %vm264_vm3, %v933_v11  ;;  %v813_v15 = vadd.f32 %v812_v12, %v723_v14 }
 0x131   : > { %863 = vst.msk [vmem:[#allocation2 + $0x78] sm:$0xff] %vm264_vm3, %v830_v10 }
 0x132   : > { %v846_v18 = vadd.f32 %v813_v15, %v328_v13 }
 0x133   : > { %v900_v16 = vld [vmem:[#allocation2 + $0x88] sm:$0xff] }
 0x134   : > { %v936_v17 = vadd.f32 %v1736_v62, %v900_v16  ;;  %v913_v19 = vld [vmem:[#allocation2 + $0xf0] sm:$0xff]  ;;  %879 = vst.msk [vmem:[#allocation2 + $0xf8] sm:$0xff] %vm264_vm3, %v846_v18 }
 0x135   : > { %v949_v20 = vadd.f32 %v1736_v62, %v913_v19 }
 0x136   : > { %968 = vst.msk [vmem:[%s1740_s11 + $0x88] sm:$0xff] %vm264_vm3, %v936_v17 }
 0x137   : > { %981 = vst.msk [vmem:[%s1740_s11 + $0xf0] sm:$0xff] %vm264_vm3, %v949_v20 }
 0x138   : > { %v898_v21 = vld [vmem:[#allocation2 + $0x78] sm:$0xff] }
 0x139   : > { %v934_v22 = vadd.f32 %v1736_v62, %v898_v21 }
 0x13b   : > { %966 = vst.msk [vmem:[%s1740_s11 + $0x78] sm:$0xff] %vm264_vm3, %v934_v22  ;;  %v914_v23 = vld [vmem:[#allocation2 + $0xf8] sm:$0xff] }
 0x13c   : > { %v950_v24 = vadd.f32 %v1736_v62, %v914_v23 }
 0x13e   : > { %982 = vst.msk [vmem:[%s1740_s11 + $0xf8] sm:$0xff] %vm264_vm3, %v950_v24 }
 0x13f   : > { %1447 = shalt.err (!%p1444_p5)
}
 0x140   : > { %s1502_s7 = smov 128   ;;  %s1503_s9 = smov 8  }
 0x141   : > { %1360 = dma.vmem_to_hbm [thread:$0]  (%p1564_p4), %s998_s15, 4096, %s1000_s26, %s984_s27, %s1502_s7, %s1502_s7, %s1503_s9  }
 0x142 PF: > { %p1366_p6 = scmp.ge.s32.totalorder %s1498_s17, 2  ;;  %s1014_s10 = sand.u32 1, %s1478_s12  }
 0x143   : > { %s1015_s11 = scalar_lea.sflag [#allocation4], %s1014_s10 }
 0x144   : > { %p1363_p7 = pnand %p1366_p6, %p1571_p8 }
 0x146   : > { %p1364_p9 = pneg %p1363_p7 }
 0x148   : > { %1473 = dma.done.wait (%p1364_p9), %s1015_s11, 4096  }
 0x149   : > { %1475 = vsyncadd (%p1364_p9), %s1015_s11, 4294963200  ;;  %s16_s17 = sadd.s32 1, %s1498_s17   ;;  %s1916_s12 = smov %s1482_s13 }
 0x14a   : > { %p13_p10 = scmp.ge.s32.totalorder %s16_s17, 11   ;;  %s1917_s13 = smov %s1486_s14 }
 0x14b   : > { %s1918_s14 = smov %s1577_s25  ;;  %s1919_s15 = smov %s1494_s16 }
 0x14c   : > { %s1920_s16 = smov %s1922_s20  ;;  %15 = sbr.rel (!%p13_p10) target bundleno = 4 (0x4), region = 81 }
 0x151   :  { %1021 = vsyncpa [#allocation4], 1 }
 0x152   :  { %1023 = vsyncpa [#allocation4 + $0x1], 1 }

</bundles_post_ra>
